<compile_context>
chip_gen: v5e
topology: v5e:2x2
jax: 0.10.0
libtpu: 0.0.40
codegen_flags: <defaults>
</compile_context>

<pallas_src>
import functools

import jax
import jax.numpy as jnp
from jax import lax
from jax.experimental import pallas as pl
from jax.experimental.pallas import tpu as pltpu


_INV_SQRT2 = 0.7071067811865476


def _round_up(a, b):
    return (a + b - 1) // b * b


def _gelu(x, approx):
    if approx:
        # tanh approximation -> EUP slot (cheaper than the erf VALU polynomial)
        return jax.nn.gelu(x, approximate=True)
    return 0.5 * x * (1.0 + lax.erf(x * _INV_SQRT2))


def _finish(prod, b2_ref, o_ref, scratch):
    """Accumulate `prod` over the inner-dim grid axis (if tiled) and emit output."""
    if not scratch:
        # Single inner-dim step (resident weights): write straight to the output,
        # no f32 accumulator round trip.
        o_ref[...] = (prod + b2_ref[...].astype(jnp.float32)).astype(o_ref.dtype)
        return

    acc_ref = scratch[0]
    k = pl.program_id(1)

    @pl.when(k == 0)
    def _():
        acc_ref[...] = prod

    @pl.when(k > 0)
    def _():
        acc_ref[...] += prod

    @pl.when(k == pl.num_programs(1) - 1)
    def _():
        o_ref[...] = (acc_ref[...] + b2_ref[...].astype(jnp.float32)).astype(o_ref.dtype)


def _ffn_gelu_kernel(x_ref, w1_ref, b1_ref, w2_ref, b2_ref, o_ref, *scratch,
                     approx_gelu=False):
    h = jnp.dot(x_ref[...], w1_ref[...], preferred_element_type=jnp.float32)
    h = h + b1_ref[...].astype(jnp.float32)
    act = _gelu(h, approx_gelu)
    prod = jnp.dot(act.astype(w2_ref.dtype), w2_ref[...],
                   preferred_element_type=jnp.float32)
    _finish(prod, b2_ref, o_ref, scratch)


def _ffn_geglu_kernel(x_ref, w1v_ref, b1v_ref, w1g_ref, b1g_ref, w2_ref, b2_ref,
                      o_ref, *scratch, approx_gelu=False):
    x = x_ref[...]
    val = jnp.dot(x, w1v_ref[...], preferred_element_type=jnp.float32)
    val = val + b1v_ref[...].astype(jnp.float32)
    gate = jnp.dot(x, w1g_ref[...], preferred_element_type=jnp.float32)
    gate = gate + b1g_ref[...].astype(jnp.float32)
    act = val * _gelu(gate, approx_gelu)
    prod = jnp.dot(act.astype(w2_ref.dtype), w2_ref[...],
                   preferred_element_type=jnp.float32)
    _finish(prod, b2_ref, o_ref, scratch)


def prepare_params(params, *, glu):
    """One-time weight preprocessing (pad / GLU-split).  Call once per model and
    reuse the result; feed_forward also accepts raw params and preps on the fly."""
    if params.get("_prepared", False):
        return params
    w1, b1, w2, b2 = params["w1"], params["b1"], params["w2"], params["b2"]
    b1 = b1.reshape(1, -1)
    b2 = b2.reshape(1, -1)
    dim = w1.shape[0]
    inner_dim, dim_out = w2.shape
    inner_pad = _round_up(inner_dim, 256)    # 256-aligned inner tiles (v6e/v7x MXU)
    dim_out_pad = _round_up(dim_out, 128)    # lane-dense output stores
    pad_n = inner_pad - inner_dim
    pad_o = dim_out_pad - dim_out
    # Zero-padding of weights/biases contributes exact zeros to the output.
    prep = {
        "_prepared": True, "glu": glu, "dim": dim, "inner_dim": inner_dim,
        "dim_out": dim_out, "inner_pad": inner_pad, "dim_out_pad": dim_out_pad,
        "w2": jnp.pad(w2, ((0, pad_n), (0, pad_o))),
        "b2": jnp.pad(b2, ((0, 0), (0, pad_o))),
    }
    if glu:
        # [value | gate] column layout, matching GEGLU's proj(x).chunk(2, dim=-1).
        prep["w1v"] = jnp.pad(w1[:, :inner_dim], ((0, 0), (0, pad_n)))
        prep["w1g"] = jnp.pad(w1[:, inner_dim:], ((0, 0), (0, pad_n)))
        prep["b1v"] = jnp.pad(b1[:, :inner_dim], ((0, 0), (0, pad_n)))
        prep["b1g"] = jnp.pad(b1[:, inner_dim:], ((0, 0), (0, pad_n)))
    else:
        prep["w1"] = jnp.pad(w1, ((0, 0), (0, pad_n)))
        prep["b1"] = jnp.pad(b1, ((0, 0), (0, pad_n)))
    return prep


@functools.lru_cache(maxsize=1)
def _vmem_capacity_bytes():
    try:
        cap = int(getattr(pltpu.get_tpu_info(), "vmem_capacity_bytes", 0))
        if cap > 0:
            return cap
    except Exception:
        pass
    try:
        kind = jax.devices()[0].device_kind.lower()
        if "v7" in kind:
            return 64 << 20
        if "v2" in kind or "v3" in kind:
            return 16 << 20
        if "v4" in kind or "v5" in kind or "v6" in kind:
            return 128 << 20
    except Exception:
        pass
    return 64 << 20  # conservative default


def _select_config(M, dim, inner_pad, dim_out_pad, x_item, w_item, glu,
                   tile_m_req, tile_n_req, budget, force_streaming):
    """Pick (tile_m, tile_n) given the VMEM budget.  Prefers resident weights
    (single inner-dim step); falls back to streaming with large inner tiles."""
    sub = max(8, 32 // x_item)           # sublane tile: 8 for f32, 16 for bf16
    lanes_dim = _round_up(dim, 128)      # conservative VMEM footprint of dim

    def act_bytes(tm, with_acc):
        b = 2 * tm * lanes_dim * x_item + 2 * tm * dim_out_pad * x_item
        if with_acc:
            b += tm * dim_out_pad * 4
        return b

    def weight_bytes(tn):
        nmul = 2 if glu else 1
        return (2 * lanes_dim * tn * w_item * nmul      # W1 (value [+ gate])
                + 2 * 16 * tn * w_item * nmul           # b1
                + 2 * tn * dim_out_pad * w_item         # W2
                + 2 * 16 * dim_out_pad * w_item)        # b2

    slack = 2 << 20                      # compiler-internal scratch headroom

    # M tiling: honor the request, never exceed M, and keep >= 2 tiles so the
    # leading 'parallel' axis can shard across v7x's two TensorCores.
    tile_m = max(sub, min(_round_up(tile_m_req, sub), _round_up(M, sub)))
    if M > sub:
        tile_m = min(tile_m, _round_up((M + 1) // 2, sub))

    # Preferred: weights fully resident (tile_n = inner_pad, single k step) so
    # every W1/W2 byte is DMA'd from HBM exactly once per call.
    if not force_streaming:
        tm = tile_m
        while tm > sub and weight_bytes(inner_pad) + act_bytes(tm, False) + slack > budget:
            tm = max(sub, _round_up(tm // 2, sub))
        if weight_bytes(inner_pad) + act_bytes(tm, False) + slack <= budget:
            return tm, inner_pad, sub

    # Streaming fallback: largest inner tile (multiple of 256 when possible)
    # dividing inner_pad; shrink tile_m first, then tile_n, to fit the budget.
    tn = max(256, min(_round_up(tile_n_req, 256), inner_pad))
    while tn > 256 and inner_pad % tn:
        tn -= 256
    tm = tile_m
    while weight_bytes(tn) + act_bytes(tm, True) + slack > budget:
        if tm > 256:
            tm = max(256, _round_up(tm // 2, sub))
        elif tn > 256:
            tn_new = max(256, tn // 2)
            while tn_new > 256 and inner_pad % tn_new:
                tn_new -= 256
            tn = tn_new
        elif tm > sub:
            tm = max(sub, _round_up(tm // 2, sub))
        else:
            break
    return tm, tn, sub


def feed_forward(x, params, *, glu, tile_m=1024, tile_n=1024, approx_gelu=False,
                 force_streaming=False, vmem_budget_bytes=None):
    """x: (B, S, dim).  `params` is either raw {"w1","b1","w2","b2"} or the
    output of prepare_params (prep once per model for best performance)."""
    p = prepare_params(params, glu=glu)
    B, S, dim = x.shape
    assert dim == p["dim"]
    inner_pad, dim_out_pad, dim_out = p["inner_pad"], p["dim_out_pad"], p["dim_out"]

    x_item = jnp.dtype(x.dtype).itemsize
    w_item = jnp.dtype(p["w2"].dtype).itemsize

    if vmem_budget_bytes is None:
        cap = _vmem_capacity_bytes()
        vmem_budget_bytes = max(min(int(cap * 0.85), cap - (16 << 20)), cap // 2)

    M = B * S
    tile_m_eff, tile_n_eff, _ = _select_config(
        M, dim, inner_pad, dim_out_pad, x_item, w_item, glu,
        tile_m, tile_n, vmem_budget_bytes, force_streaming)

    M_pad = _round_up(M, tile_m_eff)
    x2d = x.reshape(M, dim)
    if M_pad != M:
        # TODO(synk): pad only the ragged tail block instead of copying all of x.
        x2d = jnp.pad(x2d, ((0, M_pad - M), (0, 0)))

    single_step = (tile_n_eff == inner_pad)

    if glu:
        kernel = functools.partial(_ffn_geglu_kernel, approx_gelu=approx_gelu)
        weight_ops = (p["w1v"], p["b1v"], p["w1g"], p["b1g"], p["w2"], p["b2"])
        w_specs = [
            pl.BlockSpec((dim, tile_n_eff), lambda i, k: (0, k)),          # W1 value
            pl.BlockSpec((1, tile_n_eff), lambda i, k: (0, k)),            # b1 value
            pl.BlockSpec((dim, tile_n_eff), lambda i, k: (0, k)),          # W1 gate
            pl.BlockSpec((1, tile_n_eff), lambda i, k: (0, k)),            # b1 gate
            pl.BlockSpec((tile_n_eff, dim_out_pad), lambda i, k: (k, 0)),  # W2
            pl.BlockSpec((1, dim_out_pad), lambda i, k: (0, 0)),           # b2
        ]
    else:
        kernel = functools.partial(_ffn_gelu_kernel, approx_gelu=approx_gelu)
        weight_ops = (p["w1"], p["b1"], p["w2"], p["b2"])
        w_specs = [
            pl.BlockSpec((dim, tile_n_eff), lambda i, k: (0, k)),          # W1
            pl.BlockSpec((1, tile_n_eff), lambda i, k: (0, k)),            # b1
            pl.BlockSpec((tile_n_eff, dim_out_pad), lambda i, k: (k, 0)),  # W2
            pl.BlockSpec((1, dim_out_pad), lambda i, k: (0, 0)),           # b2
        ]

    grid = (M_pad // tile_m_eff, inner_pad // tile_n_eff)
    scratch_shapes = ([] if single_step
                      else [pltpu.VMEM((tile_m_eff, dim_out_pad), jnp.float32)])

    out2d = pl.pallas_call(
        kernel,
        out_shape=jax.ShapeDtypeStruct((M_pad, dim_out_pad), x.dtype),
        grid_spec=pltpu.PrefetchScalarGridSpec(
            num_scalar_prefetch=0,
            grid=grid,
            in_specs=[pl.BlockSpec((tile_m_eff, dim), lambda i, k: (i, 0))] + w_specs,
            out_specs=pl.BlockSpec((tile_m_eff, dim_out_pad), lambda i, k: (i, 0)),
            scratch_shapes=scratch_shapes,
        ),
        compiler_params=pltpu.CompilerParams(
            dimension_semantics=("parallel", "arbitrary"),
            vmem_limit_bytes=int(vmem_budget_bytes),
        ),
    )(x2d, *weight_ops)

    return out2d[:M, :dim_out].reshape(B, S, dim_out)


def init_params(key, dim, inner_dim, dim_out, glu, dtype=jnp.float32):
    k1, k2, k3, k4 = jax.random.split(key, 4)
    proj_cols = inner_dim * 2 if glu else inner_dim
    w1 = jax.random.normal(k1, (dim, proj_cols), dtype) * 0.02
    b1 = jax.random.normal(k2, (1, proj_cols), dtype) * 0.02
    w2 = jax.random.normal(k3, (inner_dim, dim_out), dtype) * 0.02
    b2 = jax.random.normal(k4, (1, dim_out), dtype) * 0.02
    return {"w1": w1, "b1": b1, "w2": w2, "b2": b2}


def feed_forward_ref(x, params, *, glu):
    """Plain-JAX reference for correctness checking."""
    h = jnp.einsum("bsd,de->bse", x, params["w1"]) + params["b1"][0]
    if glu:
        inner = params["w2"].shape[0]
        val, gate = h[..., :inner], h[..., inner:]
        act = val * jax.nn.gelu(gate, approximate=False)
    else:
        act = jax.nn.gelu(h, approximate=False)
    return jnp.einsum("bse,eo->bso", act, params["w2"]) + params["b2"][0]


if __name__ == "__main__":
    key = jax.random.PRNGKey(0)
    kx1, kx2, kp1, kp2, kp3, kp4 = jax.random.split(key, 6)

    ok = True

    # Case 1: small shapes consistent with the module defaults (mult=4,
    # dim_out=dim).  Uses the one-time prepare_params path and the
    # resident-weights / single-inner-step kernel.
    B, S, dim = 2, 8, 32
    inner_dim, dim_out = dim * 4, dim
    x = jax.random.normal(kx1, (B, S, dim), jnp.float32)
    for glu, kp in ((False, kp1), (True, kp2)):
        params = init_params(kp, dim, inner_dim, dim_out, glu)
        prepped = prepare_params(params, glu=glu)       # hoisted weight prep
        out = jax.block_until_ready(feed_forward(x, prepped, glu=glu))
        ref = feed_forward_ref(x, params, glu=glu)
        ok &= bool(jnp.allclose(out, ref, atol=1e-4, rtol=1e-4))

    # Case 2: ragged M + forced streaming with small tiles, exercising padding
    # and the multi-step inner-dim accumulator path.
    B2, S2, dim2 = 2, 13, 32          # M = 26 -> padded
    inner2, dim_out2 = 512, 32
    x2 = jax.random.normal(kx2, (B2, S2, dim2), jnp.float32)
    for glu, kp in ((False, kp3), (True, kp4)):
        params = init_params(kp, dim2, inner2, dim_out2, glu)
        out = jax.block_until_ready(
            feed_forward(x2, params, glu=glu, tile_m=8, tile_n=256,
                         force_streaming=True))
        ref = feed_forward_ref(x2, params, glu=glu)
        ok &= bool(jnp.allclose(out, ref, atol=1e-4, rtol=1e-4))

    if ok:
        print("KERNEL_OK")
    else:
        print("KERNEL_MISMATCH")
</pallas_src>

<mosaic_0001>
module attributes {stable_mosaic.version = 11 : i64} {
  func.func @_ffn_gelu_kernel(%arg0: i32, %arg1: i32, %arg2: memref<8x32xf32, #tpu.memory_space<vmem>>, %arg3: memref<32x256xf32, #tpu.memory_space<vmem>>, %arg4: memref<1x256xf32, #tpu.memory_space<vmem>>, %arg5: memref<256x128xf32, #tpu.memory_space<vmem>>, %arg6: memref<1x128xf32, #tpu.memory_space<vmem>>, %arg7: memref<8x128xf32, #tpu.memory_space<vmem>>) attributes {dimension_semantics = [#tpu.dimension_semantics<parallel>, #tpu.dimension_semantics<arbitrary>], iteration_bounds = array<i64: 2, 1>, scalar_prefetch = 0 : i64, scratch_operands = 0 : i64, tpu.core_type = #tpu.core_type<tc>, window_params = [{transform_indices = @transform_0, window_bounds = array<i64: 8, 32>}, {transform_indices = @transform_1, window_bounds = array<i64: 32, 256>}, {transform_indices = @transform_2, window_bounds = array<i64: 1, 256>}, {transform_indices = @transform_3, window_bounds = array<i64: 256, 128>}, {pipeline_mode = #tpu.pipeline_mode<synchronous>, transform_indices = @transform_4, window_bounds = array<i64: 1, 128>}, {transform_indices = @transform_5, window_bounds = array<i64: 8, 128>}]} {
    %c0 = arith.constant 0 : index
    %c0_0 = arith.constant 0 : index
    %0 = vector.load %arg2[%c0, %c0_0] : memref<8x32xf32, #tpu.memory_space<vmem>>, vector<8x32xf32>
    %c0_1 = arith.constant 0 : index
    %c0_2 = arith.constant 0 : index
    %1 = vector.load %arg3[%c0_1, %c0_2] : memref<32x256xf32, #tpu.memory_space<vmem>>, vector<32x256xf32>
    %cst = arith.constant dense<0.000000e+00> : vector<8x256xf32>
    %2 = tpu.matmul %0, %1, %cst {dimension_numbers = #tpu.dot_dimension_numbers<[1], [0], [0], [1], [0, 0, 1, 1], [], []>} : vector<8x32xf32>, vector<32x256xf32>, vector<8x256xf32> -> vector<8x256xf32>
    %c0_3 = arith.constant 0 : index
    %c0_4 = arith.constant 0 : index
    %3 = vector.load %arg4[%c0_3, %c0_4] : memref<1x256xf32, #tpu.memory_space<vmem>>, vector<1x256xf32>
    %4 = vector.broadcast %3 : vector<1x256xf32> to vector<8x256xf32>
    %5 = arith.addf %2, %4 : vector<8x256xf32>
    %cst_5 = arith.constant 5.000000e-01 : f32
    %6 = vector.broadcast %cst_5 : f32 to vector<8x256xf32>
    %7 = arith.mulf %6, %5 : vector<8x256xf32>
    %cst_6 = arith.constant 0.707106769 : f32
    %8 = vector.broadcast %cst_6 : f32 to vector<8x256xf32>
    %9 = arith.mulf %5, %8 : vector<8x256xf32>
    %10 = math.erf %9 : vector<8x256xf32>
    %cst_7 = arith.constant 1.000000e+00 : f32
    %11 = vector.broadcast %cst_7 : f32 to vector<8x256xf32>
    %12 = arith.addf %11, %10 : vector<8x256xf32>
    %13 = arith.mulf %7, %12 : vector<8x256xf32>
    %c0_8 = arith.constant 0 : index
    %c0_9 = arith.constant 0 : index
    %14 = vector.load %arg5[%c0_8, %c0_9] : memref<256x128xf32, #tpu.memory_space<vmem>>, vector<256x128xf32>
    %cst_10 = arith.constant dense<0.000000e+00> : vector<8x128xf32>
    %15 = tpu.matmul %13, %14, %cst_10 {dimension_numbers = #tpu.dot_dimension_numbers<[1], [0], [0], [1], [0, 0, 1, 1], [], []>} : vector<8x256xf32>, vector<256x128xf32>, vector<8x128xf32> -> vector<8x128xf32>
    %c0_11 = arith.constant 0 : index
    %c0_12 = arith.constant 0 : index
    %16 = vector.load %arg6[%c0_11, %c0_12] : memref<1x128xf32, #tpu.memory_space<vmem>>, vector<1x128xf32>
    %17 = vector.broadcast %16 : vector<1x128xf32> to vector<8x128xf32>
    %18 = arith.addf %15, %17 : vector<8x128xf32>
    %c0_13 = arith.constant 0 : index
    %c0_14 = arith.constant 0 : index
    %19 = vector.load %arg7[%c0_13, %c0_14] : memref<8x128xf32, #tpu.memory_space<vmem>>, vector<8x128xf32>
    tpu.vector_store %arg7[%c0_13, %c0_14], %18 {strides = array<i32>} : memref<8x128xf32, #tpu.memory_space<vmem>>, vector<8x128xf32>,
    return
  }
  func.func @transform_0(%arg0: i32, %arg1: i32) -> (i32, i32) {
    %c0_i32 = arith.constant 0 : i32
    %c0_i32_0 = arith.constant 0 : i32
    return %arg0, %c0_i32 : i32, i32
  }
  func.func @transform_1(%arg0: i32, %arg1: i32) -> (i32, i32) {
    %c0_i32 = arith.constant 0 : i32
    %c0_i32_0 = arith.constant 0 : i32
    return %c0_i32, %arg1 : i32, i32
  }
  func.func @transform_2(%arg0: i32, %arg1: i32) -> (i32, i32) {
    %c0_i32 = arith.constant 0 : i32
    %c0_i32_0 = arith.constant 0 : i32
    return %c0_i32, %arg1 : i32, i32
  }
  func.func @transform_3(%arg0: i32, %arg1: i32) -> (i32, i32) {
    %c0_i32 = arith.constant 0 : i32
    %c0_i32_0 = arith.constant 0 : i32
    return %arg1, %c0_i32 : i32, i32
  }
  func.func @transform_4(%arg0: i32, %arg1: i32) -> (i32, i32) {
    %c0_i32 = arith.constant 0 : i32
    %c0_i32_0 = arith.constant 0 : i32
    %c0_i32_1 = arith.constant 0 : i32
    return %c0_i32, %c0_i32_0 : i32, i32
  }
  func.func @transform_5(%arg0: i32, %arg1: i32) -> (i32, i32) {
    %c0_i32 = arith.constant 0 : i32
    %c0_i32_0 = arith.constant 0 : i32
    return %arg0, %c0_i32 : i32, i32
  }
}

</mosaic_0001>

<bundles_post_ra>
// kernel: tpu_custom_call.1
= control target key start
LH: loop header
LB: loop body
LE: loop exit
PB: predicated region body
PF: predicated region fallthrough
CT: control target
= control target key end

     0   :  { %10 = vsyncpa [#allocation3], 0  ;;  %s1271_s0 = inlined_call_operand.hbm [shape: f32[16,32], index: 0, kind: input, shape index: {}]   ;;  %s1272_s1 = inlined_call_operand.hbm [shape: f32[32,256], index: 1, kind: input, shape index: {}]   ;;  %s1273_s2 = inlined_call_operand.hbm [shape: f32[1,256], index: 2, kind: input, shape index: {}]   ;;  %s1274_s3 = inlined_call_operand.hbm [shape: f32[256,128], index: 3, kind: input, shape index: {}]   ;;  %s1275_s4 = inlined_call_operand.vmem [shape: f32[1,128], index: 4, kind: input, shape index: {}]   ;;  %s1276_s5 = inlined_call_operand.hbm [shape: f32[16,128], index: 5, kind: output, shape index: {}]  }
   0x1   :  { %12 = vsyncpa [#allocation3 + $0x1], 0 }
   0x2   :  { %13 = vsyncpa [#allocation6], 0 }
   0x3   :  { %14 = vsyncpa [#allocation9], 0 }
   0x4   :  { %15 = vsyncpa [#allocation4], 0 }
   0x5   :  { %17 = vsyncpa [#allocation4 + $0x1], 0  ;;  %s1055_s18 = smov 0   ;;  %s1057_s19 = smov 0  }
   0x6   :  { %s1059_s20 = smov 0   ;;  %s1061_s21 = smov 0  }
   0x7   :  { %s1063_s22 = smov 0   ;;  %s1065_s23 = smov 0  }
   0x8 LB: > { %s681_s24 = sadd.s32 4294967295, %s1016_s23   ;;  %p683_p0 = scmp.ge.s32.totalorder %s1016_s23, 1  ;;  %s1016_s23 = sphi %s1065_s23, %s23_s23   ;;  %s1012_s22 = sphi %s1063_s22, %s1288_s22   ;;  %s1008_s21 = sphi %s1061_s21, %s1287_s21   ;;  %s1004_s20 = sphi %s1059_s20, %s1286_s20   ;;  %s1000_s19 = sphi %s1057_s19, %s1285_s19   ;;  %s996_s18 = sphi %s1055_s18, %s1284_s18  }
   0x9   : > { %p1089_p1 = scmp.eq.s32.totalorder %s681_s24, 0  ;;  %p191_p2 = scmp.lt.s32.totalorder %s1016_s23, 3 }
   0xa   : > { %s205_s28 = sshll.u32 %s1272_s1, 4  ;;  %s1018_s30 = smov [#allocation5]   ;;  %s206_s28 = int_to_ptr.hbm [resolvable:$true] %s205_s28 }
   0xb   : > { %p1097_p3 = pnand %p683_p0, %p191_p2  ;;  %s207_s6 = sshll.u32 %s1018_s30, 4  ;;  %s208_s6 = int_to_ptr.vmem [resolvable:$true] %s207_s6 }
   0xc   : > { %p687_p6 = scmp.ge.s32.totalorder %s1016_s23, 2  ;;  %s222_s10 = sshll.u32 %s1273_s2, 4  ;;  %s223_s10 = int_to_ptr.hbm [resolvable:$true] %s222_s10 }
   0xd   : > { %p720_p4 = pneg %p1097_p3  ;;  %s1019_s11 = smov 256  }
   0xe   : > { %s1020_s12 = smov 16   ;;  %s1021_s13 = smov [#allocation7]  }
   0xf   : > { %p1105_p5 = pnand %p720_p4, %p1089_p1  ;;  %s224_s14 = sshll.u32 %s1021_s13, 4  ;;  %s225_s14 = int_to_ptr.vmem [resolvable:$true] %s224_s14 }
  0x10   : > { %s236_s17 = sshll.u32 %s1274_s3, 4  ;;  %s1022_s26 = smov [#allocation8]   ;;  %s237_s17 = int_to_ptr.hbm [resolvable:$true] %s236_s17 }
  0x11   : > { %723 = dma.hbm_to_vmem [thread:$0]  (!%p1105_p5), %s206_s28, 1024, %s208_s6, [#allocation6], %s1019_s11, %s1019_s11, %s1020_s12  }
  0x12   : > { %726 = dma.hbm_to_vmem [thread:$0]  (!%p1105_p5), %s223_s10, 32, %s225_s14, [#allocation6]  }
  0x13   : > { %s238_s27 = sshll.u32 %s1022_s26, 4  ;;  %s1023_s28 = smov 128   ;;  %s239_s27 = int_to_ptr.vmem [resolvable:$true] %s238_s27 }
  0x14   : > { %s1024_s30 = smov 8   ;;  %s682_s6 = sadd.s32 4294967294, %s1016_s23  }
  0x15   : > { %729 = dma.hbm_to_vmem [thread:$0]  (!%p1105_p5), %s237_s17, 4096, %s239_s27, [#allocation9], %s1023_s28, %s1023_s28, %s1024_s30  }
  0x16   : > { %s35_s8 = sadd.s32 1, %s1012_s22  ;;  %s42_s9 = sadd.s32 1, %s1004_s20 }
  0x17   : > { %p37_p7 = scmp.ge.s32.totalorder %s35_s8, 2  ;;  %p49_p8 = scmp.ne.s32.totalorder %s1004_s20, %s1000_s19 }
  0x18   : > { %p50_p9 = scmp.eq.s32.totalorder %s1016_s23, 0  ;;  %p55_p10 = scmp.ne.s32.totalorder %s1000_s19, %s996_s18 }
  0x19   : > { %s1290_s8 = smov (%p37_p7, %s35_s8), 0  ;;  %p178_p13 = scmp.eq.s32.totalorder %s681_s24, 1 }
  0x1a   : > { %p1132_p11 = por %p50_p9, %p49_p8  ;;  %p1138_p12 = por %p1089_p1, %p55_p10 }
  0x1b   : > { %s39_s11 = ssub.s32 %s1012_s22, %s1290_s8  ;;  %p184_p2 = scmp.eq.s32.totalorder %s682_s6, 1 }
  0x1c   : > { %p40_p0 = scmp.eq.s32.totalorder %s39_s11, 0  ;;  %p1146_p4 = por %p178_p13, %p49_p8 }
  0x1d   : > { %p741_p5 = scmp.lt.s32.totalorder %s1016_s23, 2  ;;  %p1154_p7 = por %p184_p2, %p55_p10 }
  0x1e   : > { %s1152_s13 = scalar_select %p40_p0, %s1004_s20, %s42_s9  }
  0x1f   : > { %s255_s15 = sand.u32 1, %s1004_s20   ;;  %s689_s17 = sshll.u32 %s1012_s22, 3 }
  0x20   : > { %s688_s16 = sshll.u32 %s255_s15, 3  ;;  %s263_s24 = scalar_lea.hbm %s1271_s0, %s689_s17 }
  0x21   : > { %s259_s28 = scalar_lea.vmem [#allocation2], %s688_s16  ;;  %s265_s6 = sshll.u32 %s263_s24, 4  ;;  %s266_s6 = int_to_ptr.hbm [resolvable:$true] %s265_s6 }
  0x22   : > { %s267_s30 = sshll.u32 %s259_s28, 4  ;;  %p731_p8 = pnand %p741_p5, %p1132_p11  ;;  %s268_s30 = int_to_ptr.vmem [resolvable:$true] %s267_s30 }
  0x23   : > { %s256_s9 = scalar_lea.sflag [#allocation3], %s255_s15  ;;  %276 = sbr.rel (%p1097_p3) target bundleno = 371 (0x173), region = 40 }
  0x24   : > { %733 = dma.hbm_to_vmem [thread:$0]  (!%p731_p8), %s266_s6, 128, %s268_s30, %s256_s9  }
  0x25   : > { %s1168_s11 = sand.u32 (!%p1097_p3), 1, %s1000_s19  }
  0x26   : > { %s691_s17 = sshll.u32 (!%p1097_p3), %s1168_s11, 3  ;;  %s279_s16 = scalar_lea.sflag (!%p1097_p3), [#allocation3], %s1168_s11 }
  0x27   : > { %s282_s26 = scalar_lea.vmem (!%p1097_p3), [#allocation2], %s691_s17 }
  0x28   : > { %979 = dma.done.wait (%p1138_p12), %s279_s16, 128  }
  0x29   : > { %981 = vsyncadd (%p1138_p12), %s279_s16, 4294967168 }
  0x2a   : > { %983 = dma.done.wait (%p1089_p1), [#allocation6], 1056  }
  0x2b   : > { %985 = vsyncadd (%p1089_p1), [#allocation6], 4294966240 }
  0x2c   : > { %987 = dma.done.wait (%p1089_p1), [#allocation9], 4096  }
  0x2d   : > { %989 = vsyncadd (%p1089_p1), [#allocation9], 4294963200  ;;  %v335_v0 = vld [vmem:[#allocation5 + $0x30] sm:$0xff]  ;;  %v336_v1 = vld [vmem:[#allocation5 + $0x38] sm:$0xff]  ;;  %vm343_vm0 = vcmask 261120   ;;  %s701_s25 = sshll.u32 %s1008_s21, 3 }
  0x2e   : > { %v333_v2 = vld [vmem:[#allocation5 + $0x20] sm:$0xff]  ;;  %359 = vmatpush.msra.mxu0 %v335_v0  ;;  %379 = vmatpush.msra.mxu1 %v336_v1  ;;  %v334_v3 = vld [vmem:[#allocation5 + $0x28] sm:$0xff]  ;;  %v331_v4 = vld [vmem:[#allocation5 + $0x10] sm:$0xff]  ;;  %s563_s27 = scalar_lea.hbm %s1276_s5, %s701_s25  ;;  %s324_s24 = scalar_lea.vmem [#allocation10], %s691_s17 }
  0x2f   : > { %v332_v5 = vld [vmem:[#allocation5 + $0x18] sm:$0xff]  ;;  %v329_v6 = vld [vmem:[#allocation5] sm:$0xff]  ;;  %v330_v7 = vld [vmem:[#allocation5 + $0x8] sm:$0xff]  ;;  %s565_s28 = sshll.u32 %s324_s24, 4  ;;  %s567_s30 = sshll.u32 %s563_s27, 4  ;;  %s566_s28 = int_to_ptr.vmem [resolvable:$true] %s565_s28  ;;  %s568_s30 = int_to_ptr.hbm [resolvable:$true] %s567_s30 }
  0x30   : > { %360 = vmatpush.msra.mxu0 %v333_v2  ;;  %380 = vmatpush.msra.mxu1 %v334_v3  ;;  %v328_v8 = vld [vmem:[%s282_s26] sm:$0xff]  ;;  %v337_v13 = vld [vmem:[#allocation7] sm:$0x3]  ;;  %v487_v16 = vld [vmem:[#allocation8 + $0x60] sm:$0xff]  ;;  %s553_s21 = scalar_lea.sflag [#allocation4], %s1168_s11  ;;  %s940_s6 = sshra.s32 %s568_s30, 4  ;;  %s941_s6 = int_to_ptr.hbm [resolvable:$true] %s940_s6 }
  0x31   : > { %v490_v9 = vld [vmem:[#allocation8 + $0x78] sm:$0xff]  ;;  %v489_v11 = vld [vmem:[#allocation8 + $0x70] sm:$0xff]  ;;  %v488_v14 = vld [vmem:[#allocation8 + $0x68] sm:$0xff]  ;;  %v339_v18 = vperm.slane %v337_v13, 0  ;;  %v340_v19 = vperm.slane %v337_v13, 1  ;;  %s942_s9 = scalar_lea.hbm %s941_s6, 8  ;;  %p947_p10 = scmp.lt.s32.totalorder %s941_s6, %s1276_s5 }
  0x32   : > { %361 = vmatpush.msra.mxu0 %v331_v4  ;;  %381 = vmatpush.msra.mxu1 %v332_v5  ;;  %v506_v10 = vld [vmem:[#allocation8 + $0xf8] sm:$0xff]  ;;  %v505_v12 = vld [vmem:[#allocation8 + $0xf0] sm:$0xff]  ;;  %v504_v15 = vld [vmem:[#allocation8 + $0xe8] sm:$0xff]  ;;  %p943_p1 = scmp.ne.s32.totalorder %s941_s6, %s942_s9  ;;  %s946_s17 = scalar_lea.hbm %s1276_s5, 16 }
  0x33   : > { %511 = vmatpush.msra.mxu2 %v490_v9  ;;  %531 = vmatpush.msra.mxu3 %v506_v10  ;;  %v503_v17 = vld [vmem:[#allocation8 + $0xe0] sm:$0xff]  ;;  %v486_v20 = vld [vmem:[#allocation8 + $0x58] sm:$0xff]  ;;  %v485_v22 = vld [vmem:[#allocation8 + $0x50] sm:$0xff]  ;;  %p948_p11 = scmp.lt.s32.totalorder %s946_s17, %s942_s9 }
  0x34   : > { %362 = vmatpush.msra.mxu0 %v329_v6  ;;  %382 = vmatpush.msra.mxu1 %v330_v7  ;;  %v502_v21 = vld [vmem:[#allocation8 + $0xd8] sm:$0xff]  ;;  %v501_v23 = vld [vmem:[#allocation8 + $0xd0] sm:$0xff]  ;;  %v484_v26 = vld [vmem:[#allocation8 + $0x48] sm:$0xff]  ;;  %p944_p3 = pnand %p943_p1, %p1146_p4 }
  0x35   : > { %696 = vmatmul.msk.f32.vlgmr.msra.gmra.mxu0 %vm343_vm0, %v328_v8  ;;  %697 = vmatmul.msk.f32.vlgmr.msra.gmra.mxu1 %vm343_vm0, %v328_v8  ;;  %v500_v27 = vld [vmem:[#allocation8 + $0xc8] sm:$0xff]  ;;  %v483_v30 = vld [vmem:[#allocation8 + $0x40] sm:$0xff]  ;;  %v482_v34 = vld [vmem:[#allocation8 + $0x38] sm:$0xff]  ;;  %p949_p12 = por %p948_p11, %p947_p10 }
  0x36   : > { %512 = vmatpush.msra.mxu2 %v489_v11  ;;  %532 = vmatpush.msra.mxu3 %v505_v12  ;;  %v499_v31 = vld [vmem:[#allocation8 + $0xc0] sm:$0xff]  ;;  %v498_v35 = vld [vmem:[#allocation8 + $0xb8] sm:$0xff]  ;;  %v481_v38 = vld [vmem:[#allocation8 + $0x30] sm:$0xff]  ;;  %p945_p9 = pneg %p944_p3 }
  0x37   : > { %v497_v39 = vld [vmem:[#allocation8 + $0xb0] sm:$0xff]  ;;  %v480_v42 = vld [vmem:[#allocation8 + $0x28] sm:$0xff]  ;;  %v479_v47 = vld [vmem:[#allocation8 + $0x20] sm:$0xff] }
  0x38   : > { %513 = vmatpush.msra.mxu2 %v488_v14  ;;  %533 = vmatpush.msra.mxu3 %v504_v15  ;;  %v496_v43 = vld [vmem:[#allocation8 + $0xa8] sm:$0xff]  ;;  %v495_v48 = vld [vmem:[#allocation8 + $0xa0] sm:$0xff]  ;;  %v478_v53 = vld [vmem:[#allocation8 + $0x18] sm:$0xff]  ;;  %p950_p13 = pnand %p949_p12, %p945_p9 }
  0x39   : > { %v494_v54 = vld [vmem:[#allocation8 + $0x98] sm:$0xff]  ;;  %v477_v59 = vld [vmem:[#allocation8 + $0x10] sm:$0xff]  ;;  %v476_v0 = vld [vmem:[#allocation8 + $0x8] sm:$0xff] }
  0x3a   : > { %514 = vmatpush.msra.mxu2 %v487_v16  ;;  %534 = vmatpush.msra.mxu3 %v503_v17  ;;  %v493_v60 = vld [vmem:[#allocation8 + $0x90] sm:$0xff]  ;;  %v492_v1 = vld [vmem:[#allocation8 + $0x88] sm:$0xff]  ;;  %v475_v5 = vld [vmem:[#allocation8] sm:$0xff] }
  0x3b   : > { %v491_v6 = vld [vmem:[#allocation8 + $0x80] sm:$0xff] }
  0x3c   : > { %515 = vmatpush.msra.mxu2 %v486_v20  ;;  %535 = vmatpush.msra.mxu3 %v502_v21 }
  0x3e   : > { %516 = vmatpush.msra.mxu2 %v485_v22  ;;  %536 = vmatpush.msra.mxu3 %v501_v23 }
  0x40   : > { %517 = vmatpush.msra.mxu2 %v484_v26  ;;  %537 = vmatpush.msra.mxu3 %v500_v27 }
  0x42   : > { %518 = vmatpush.msra.mxu2 %v483_v30  ;;  %538 = vmatpush.msra.mxu3 %v499_v31 }
  0x44   : > { %519 = vmatpush.msra.mxu2 %v482_v34  ;;  %539 = vmatpush.msra.mxu3 %v498_v35 }
  0x46   : > { %520 = vmatpush.msra.mxu2 %v481_v38  ;;  %540 = vmatpush.msra.mxu3 %v497_v39 }
  0x48   : > { %521 = vmatpush.msra.mxu2 %v480_v42  ;;  %541 = vmatpush.msra.mxu3 %v496_v43 }
  0x4a   : > { %522 = vmatpush.msra.mxu2 %v479_v47  ;;  %542 = vmatpush.msra.mxu3 %v495_v48 }
  0x4c   : > { %523 = vmatpush.msra.mxu2 %v478_v53  ;;  %543 = vmatpush.msra.mxu3 %v494_v54 }
  0x4e   : > { %524 = vmatpush.msra.mxu2 %v477_v59  ;;  %544 = vmatpush.msra.mxu3 %v493_v60 }
  0x50   : > { %525 = vmatpush.msra.mxu2 %v476_v0  ;;  %545 = vmatpush.msra.mxu3 %v492_v1 }
  0x52   : > { %526 = vmatpush.msra.mxu2 %v475_v5  ;;  %546 = vmatpush.msra.mxu3 %v491_v6 }
  0xb2   : > { %v364_v24 = vpop.f32.mrf.mxu0  ;;  %v384_v25 = vpop.f32.mrf.mxu1 }
  0xb3   : > { %v1186_v28 = vadd.f32 %v364_v24, %v339_v18  ;;  %v1188_v29 = vadd.f32 %v384_v25, %v340_v19 }
  0xb5   : > { %v1191_v32 = vmul.f32 0.70710677, %v1186_v28  ;;  %v1194_v33 = vmul.f32 0.70710677, %v1188_v29  ;;  %v387_v60 = vmul.f32 0.5, %v1186_v28 }
  0xb7   : > { %v391_v36 = vmul.f32 %v1191_v32, %v1191_v32  ;;  %v431_v37 = vmul.f32 %v1194_v33, %v1194_v33 }
  0xb9   : > { %v1200_v40 = vmin.f32 %v391_v36, 16.0  ;;  %v1202_v41 = vmin.f32 %v431_v37, 16.0 }
  0xbb   : > { %v393_v44 = vmul.f32 2.1237322e-06, %v1200_v40  ;;  %v433_v45 = vmul.f32 2.1237322e-06, %v1202_v41  ;;  %v404_v46 = vmul.f32 3.8918573e-05, %v1200_v40 }
  0xbc   : > { %v444_v49 = vmul.f32 3.8918573e-05, %v1202_v41 }
  0xbd   : > { %v394_v50 = vadd.f32 0.00028619796, %v393_v44  ;;  %v434_v51 = vadd.f32 0.00028619796, %v433_v45  ;;  %v405_v52 = vadd.f32 0.001143296, %v404_v46 }
  0xbe   : > { %v445_v55 = vadd.f32 0.001143296, %v444_v49 }
  0xbf   : > { %v395_v56 = vmul.f32 %v394_v50, %v1200_v40  ;;  %v435_v57 = vmul.f32 %v434_v51, %v1202_v41  ;;  %v406_v58 = vmul.f32 %v405_v52, %v1200_v40 }
  0xc0   : > { %v446_v61 = vmul.f32 %v445_v55, %v1202_v41 }
  0xc1   : > { %v396_v62 = vadd.f32 0.0036580483, %v395_v56  ;;  %v407_v63 = vadd.f32 0.014752088, %v406_v58  ;;  %v436_v3 = vadd.f32 0.0036580483, %v435_v57 }
  0xc2   : > { %v447_v2 = vadd.f32 0.014752088, %v446_v61 }
  0xc3   : > { %v408_v4 = vmul.f32 %v407_v63, %v1200_v40  ;;  %v397_v8 = vmul.f32 %v396_v62, %v1200_v40  ;;  %v437_v11 = vmul.f32 %v436_v3, %v1202_v41 }
  0xc4   : > { %v448_v7 = vmul.f32 %v447_v2, %v1202_v41 }
  0xc5   : > { %v409_v9 = vadd.f32 0.112945676, %v408_v4  ;;  %v398_v14 = vadd.f32 0.05243302, %v397_v8  ;;  %v438_v17 = vadd.f32 0.05243302, %v437_v11 }
  0xc6   : > { %v449_v10 = vadd.f32 0.112945676, %v448_v7 }
  0xc7   : > { %v410_v12 = vmul.f32 %v409_v9, %v1200_v40  ;;  %v399_v20 = vmul.f32 %v398_v14, %v1200_v40  ;;  %v439_v23 = vmul.f32 %v438_v17, %v1202_v41 }
  0xc8   : > { %v450_v13 = vmul.f32 %v449_v10, %v1202_v41 }
  0xc9   : > { %v411_v15 = vadd.f32 0.4994258, %v410_v12  ;;  %v400_v24 = vadd.f32 0.18741608, %v399_v20  ;;  %v440_v25 = vadd.f32 0.18741608, %v439_v23 }
  0xca   : > { %v451_v16 = vadd.f32 0.4994258, %v450_v13 }
  0xcb   : > { %v412_v18 = vmul.f32 %v411_v15, %v1200_v40  ;;  %v401_v27 = vmul.f32 %v400_v24, %v1200_v40  ;;  %v441_v34 = vmul.f32 %v440_v25, %v1202_v41 }
  0xcc   : > { %v452_v19 = vmul.f32 %v451_v16, %v1202_v41 }
  0xcd   : > { %v413_v21 = vadd.f32 1.0, %v412_v18  ;;  %v402_v37 = vadd.f32 1.1283791, %v401_v27  ;;  %v442_v45 = vadd.f32 1.1283791, %v441_v34 }
  0xce   : > { %v453_v22 = vadd.f32 1.0, %v452_v19 }
  0xcf   : > { %802 = vrcp.f32 %v413_v21  ;;  %v425_v38 = vand.u32 2147483648, %v413_v21  ;;  %v423_v43 = vand.u32 2147483647, %v413_v21  ;;  %vm419_vm3 = vweird.f32 %v413_v21 }
  0xd0   : > { %804 = vrcp.f32 %v453_v22  ;;  %v465_v44 = vand.u32 2147483648, %v453_v22  ;;  %v463_v47 = vand.u32 2147483647, %v453_v22  ;;  %vm459_vm5 = vweird.f32 %v453_v22 }
  0xd1   : > { %v426_v40 = vor.u32 1.1754944e-38, %v425_v38  ;;  %v403_v41 = vmul.f32 %v402_v37, %v1191_v32  ;;  %vm424_vm6 = vcmp.eq.f32.partialorder %v423_v43, 8.507059e+37  ;;  %v443_v52 = vmul.f32 %v442_v45, %v1194_v33  ;;  %v801_v33 = vld [vmem:[%s1275_s4] ss:$0 sm:$0xff] }
  0xd2   : > { %v466_v51 = vor.u32 1.1754944e-38, %v465_v44  ;;  %vm464_vm8 = vcmp.eq.f32.partialorder %v463_v47, 8.507059e+37  ;;  %v388_v32 = vmul.f32 0.5, %v1188_v29 }
  0xd5   : > { %v803_v26 = vpop.eup %802 }
  0xd6   : > { %v805_v30 = vpop.eup %804  ;;  %v415_v31 = vmul.f32 %v803_v26, %v413_v21  ;;  %vm420_vm1 = vweird.f32 %v803_v26 }
  0xd7   : > { %v455_v35 = vmul.f32 %v805_v30, %v453_v22  ;;  %vm460_vm2 = vweird.f32 %v805_v30  ;;  %vm421_vm4 = vmor %vm419_vm3, %vm420_vm1 }
  0xd8   : > { %v416_v36 = vsub.f32 1.0, %v415_v31  ;;  %vm461_vm7 = vmor %vm459_vm5, %vm460_vm2 }
  0xd9   : > { %v456_v39 = vsub.f32 1.0, %v455_v35 }
  0xda   : > { %v417_v42 = vmul.f32 %v803_v26, %v416_v36 }
  0xdb   : > { %v457_v46 = vmul.f32 %v805_v30, %v456_v39 }
  0xdc   : > { %v418_v48 = vadd.f32 %v803_v26, %v417_v42 }
  0xdd   : > { %v458_v49 = vadd.f32 %v805_v30, %v457_v46 }
  0xde   : > { %v422_v50 = vsel %vm421_vm4, %v803_v26, %v418_v48 }
  0xdf   : > { %v427_v53 = vsel %vm424_vm6, %v426_v40, %v422_v50  ;;  %v462_v54 = vsel %vm461_vm7, %v805_v30, %v458_v49 }
  0xe0   : > { %v428_v55 = vmul.f32 %v427_v53, %v403_v41  ;;  %v467_v56 = vsel %vm464_vm8, %v466_v51, %v462_v54 }
  0xe1   : > { %v468_v57 = vmul.f32 %v467_v56, %v443_v52 }
  0xe2   : > { %v698_v58 = vclamps-f32 %v428_v55, 1.0 }
  0xe3   : > { %v699_v59 = vclamps-f32 %v468_v57, 1.0 }
  0xe4   : > { %v471_v61 = vadd.f32 1.0, %v698_v58 }
  0xe5   : > { %v472_v62 = vadd.f32 1.0, %v699_v59 }
  0xe6   : > { %v473_v63 = vmul.f32 %v471_v61, %v387_v60 }
  0xe7   : > { %v474_v0 = vmul.f32 %v472_v62, %v388_v32 }
  0xe8   : > { %527 = vmatmul.f32.vlgmr.msra.gmra.mxu2 %v473_v63 }
  0xe9   : > { %547 = vmatmul.f32.vlgmr.msra.gmra.mxu3 %v474_v0 }
 0x16b   : > { %v528_v28 = vpop.f32.mrf.mxu2 }
 0x16c   : > { %v529_v29 = vadd.f32 %v801_v33, %v528_v28  ;;  %v548_v1 = vpop.f32.mrf.mxu3 }
 0x16e   : > { %v549_v2 = vadd.f32 %v548_v1, %v529_v29 }
 0x170   : > { %551 = vst [vmem:[%s324_s24] sm:$0xff] %v549_v2 }
 0x171   : > { %953 = shalt.err (!%p950_p13)
}
 0x172   : > { %718 = dma.vmem_to_hbm [thread:$0]  (%p1146_p4), %s566_s28, 128, %s568_s30, %s553_s21  }
 0x173 PF: > { %s579_s11 = sand.u32 1, %s996_s18   ;;  %p735_p0 = pnand %p687_p6, %p1154_p7 }
 0x174   : > { %s580_s10 = scalar_lea.sflag [#allocation4], %s579_s11 }
 0x175   : > { %p736_p2 = pneg %p735_p0 }
 0x177   : > { %991 = dma.done.wait (%p736_p2), %s580_s10, 128  }
 0x178   : > { %993 = vsyncadd (%p736_p2), %s580_s10, 4294967168  ;;  %s23_s23 = sadd.s32 1, %s1016_s23   ;;  %s1284_s18 = smov %s1000_s19 }
 0x179   : > { %p20_p5 = scmp.ge.s32.totalorder %s23_s23, 4   ;;  %s1285_s19 = smov %s1004_s20 }
 0x17a   : > { %s1286_s20 = smov %s1152_s13  ;;  %s1287_s21 = smov %s1012_s22 }
 0x17b   : > { %s1288_s22 = smov %s1290_s8  ;;  %22 = sbr.rel (!%p20_p5) target bundleno = 8 (0x8), region = 100 }
 0x180   :  { %586 = vsyncpa [#allocation3], 1 }
 0x181   :  { %588 = vsyncpa [#allocation3 + $0x1], 1 }
 0x182   :  { %589 = vsyncpa [#allocation6], 1 }
 0x183   :  { %590 = vsyncpa [#allocation9], 1 }
 0x184   :  { %591 = vsyncpa [#allocation4], 1 }
 0x185   :  { %593 = vsyncpa [#allocation4 + $0x1], 1 }

</bundles_post_ra>
